<compile_context>
chip_gen: v7x
topology: tpu7x:2x2x1
jax: 0.10.0
libtpu: 0.0.40
codegen_flags: <defaults>
</compile_context>

<pallas_src>
import functools

import jax
import jax.numpy as jnp
from jax import lax
from jax.experimental import pallas as pl
from jax.experimental.pallas import tpu as pltpu


def _round_up(x, m):
    return ((x + m - 1) // m) * m


# ---------------------------------------------------------------------------
# Pallas kernel
# ---------------------------------------------------------------------------
def _difference_loss_kernel(a_ref, b_ref, o_ref, ga_acc, gb_acc, *, scale, eps):
    # a_ref, b_ref : (Bp, tile_k) f32 VMEM tiles of the flattened inputs
    # o_ref        : (1, 1) f32 output (the loss)
    # ga_acc/gb_acc: (Bp, Bp) f32 VMEM Gram accumulators
    k = pl.program_id(0)

    @pl.when(k == 0)
    def _init():
        ga_acc[...] = jnp.zeros_like(ga_acc)
        gb_acc[...] = jnp.zeros_like(gb_acc)

    a = a_ref[...]
    b = b_ref[...]
    # einsum('ik,jk->ij'): contract the (large) feature dim on the MXU.
    dims = (((1,), (1,)), ((), ()))
    ga_acc[...] += lax.dot_general(a, a, dims, preferred_element_type=jnp.float32)
    gb_acc[...] += lax.dot_general(b, b, dims, preferred_element_type=jnp.float32)

    @pl.when(k == pl.num_programs(0) - 1)
    def _finalize():
        ga = ga_acc[...]
        gb = gb_acc[...]
        bp = ga.shape[0]

        # Row norms are sqrt(diag(Gram)). Build both a column- and a
        # row-shaped view of 1/(norm+eps) via reductions so no in-kernel
        # transpose is needed.
        row = lax.broadcasted_iota(jnp.int32, (bp, bp), 0)
        col = lax.broadcasted_iota(jnp.int32, (bp, bp), 1)
        eye = row == col
        diag_a = jnp.where(eye, ga, 0.0)
        diag_b = jnp.where(eye, gb, 0.0)
        inv_a_col = 1.0 / (jnp.sqrt(jnp.sum(diag_a, axis=1, keepdims=True)) + eps)
        inv_a_row = 1.0 / (jnp.sqrt(jnp.sum(diag_a, axis=0, keepdims=True)) + eps)
        inv_b_col = 1.0 / (jnp.sqrt(jnp.sum(diag_b, axis=1, keepdims=True)) + eps)
        inv_b_row = 1.0 / (jnp.sqrt(jnp.sum(diag_b, axis=0, keepdims=True)) + eps)

        ga_n = ga * (inv_a_col * inv_a_row)   # == A_l2 @ A_l2^T
        gb_n = gb * (inv_b_col * inv_b_row)   # == B_l2 @ B_l2^T

        s = jnp.sum(ga_n * gb_n, axis=1, keepdims=True)
        s = jnp.sum(s, axis=0, keepdims=True)            # (1, 1)
        o_ref[...] = s * scale                           # scale = 1/(Da*Db)


# ---------------------------------------------------------------------------
# Wrapper
# ---------------------------------------------------------------------------
def difference_loss(a, b, *, tile_k=32768):
    """Pallas TPU forward of DifferenceLoss: mean((a_l2^T @ b_l2)^2)."""
    assert a.shape[0] == b.shape[0], "batch dims must match"
    batch = a.shape[0]
    a2 = a.reshape(batch, -1).astype(jnp.float32)
    b2 = b.reshape(batch, -1).astype(jnp.float32)
    da, db = a2.shape[1], b2.shape[1]

    bp = _round_up(batch, 8)                  # full sublanes
    dp = _round_up(max(da, db), 128)          # lane-dense feature tiles
    tile_k = min(_round_up(tile_k, 128), dp)  # (bp, tile_k) f32 <= ~1 MiB/buffer
    dp = _round_up(dp, tile_k)
    nk = dp // tile_k

    # Zero padding is exact: padded rows/columns contribute nothing to the
    # Gram matrices, and the final mean divides by the true Da*Db.
    if bp == batch and dp == da:
        a_p = a2
    else:
        a_p = jnp.zeros((bp, dp), jnp.float32).at[:batch, :da].set(a2)
    if bp == batch and dp == db:
        b_p = b2
    else:
        b_p = jnp.zeros((bp, dp), jnp.float32).at[:batch, :db].set(b2)

    kernel = functools.partial(
        _difference_loss_kernel, scale=1.0 / float(da * db), eps=1e-6)

    out = pl.pallas_call(
        kernel,
        out_shape=jax.ShapeDtypeStruct((1, 1), jnp.float32),
        grid=(nk,),
        in_specs=[
            pl.BlockSpec((bp, tile_k), lambda k: (0, k)),
            pl.BlockSpec((bp, tile_k), lambda k: (0, k)),
        ],
        out_specs=pl.BlockSpec((1, 1), lambda k: (0, 0)),
        scratch_shapes=[
            pltpu.VMEM((bp, bp), jnp.float32),
            pltpu.VMEM((bp, bp), jnp.float32),
        ],
        compiler_params=pltpu.CompilerParams(
            dimension_semantics=("arbitrary",)),   # reduction over feature tiles
    )(a_p, b_p)
    return out[0, 0]


# ---------------------------------------------------------------------------
# Pure-JAX reference (mirrors the PyTorch module literally)
# ---------------------------------------------------------------------------
def reference_difference_loss(a, b):
    batch = a.shape[0]
    a2 = a.reshape(batch, -1).astype(jnp.float32)
    b2 = b.reshape(batch, -1).astype(jnp.float32)
    an = jnp.sqrt(jnp.sum(a2 * a2, axis=1, keepdims=True))
    bn = jnp.sqrt(jnp.sum(b2 * b2, axis=1, keepdims=True))
    a_l2 = a2 / (an + 1e-6)
    b_l2 = b2 / (bn + 1e-6)
    g = a_l2.T @ b_l2
    return jnp.mean(g * g)


if __name__ == "__main__":
    key = jax.random.PRNGKey(0)
    ka, kb = jax.random.split(key)

    # (B, C, H, W) inputs; forward flattens to (B, C*H*W) = (2, 1024)
    a = jax.random.normal(ka, (2, 4, 16, 16), dtype=jnp.float32)
    b = jax.random.normal(kb, (2, 4, 16, 16), dtype=jnp.float32)

    # single-resident-tile path (nk = 1)
    out = jax.block_until_ready(difference_loss(a, b))
    # multi-step reduction path (nk = 4) to exercise the accumulator grid
    out_tiled = jax.block_until_ready(difference_loss(a, b, tile_k=256))

    ref = reference_difference_loss(a, b)
    ref_f = float(ref)
    for name, val in (("resident", out), ("tiled", out_tiled)):
        assert val.shape == (), (name, val.shape)
        assert bool(jnp.isfinite(val)), name
        err = abs(float(val) - ref_f)
        assert err <= 1e-6 + 1e-4 * abs(ref_f), f"{name}: {float(val)} vs {ref_f}"

    print("KERNEL_OK")
</pallas_src>

<mosaic_0001>
module attributes {stable_mosaic.version = 11 : i64} {
  func.func @_difference_loss_kernel(%arg0: i32, %arg1: memref<8x1024xf32, #tpu.memory_space<vmem>>, %arg2: memref<8x1024xf32, #tpu.memory_space<vmem>>, %arg3: memref<1x1xf32, #tpu.memory_space<vmem>>, %arg4: memref<8x8xf32, #tpu.memory_space<vmem>>, %arg5: memref<8x8xf32, #tpu.memory_space<vmem>>) attributes {dimension_semantics = [#tpu.dimension_semantics<arbitrary>], iteration_bounds = array<i64: 1>, scalar_prefetch = 0 : i64, scratch_operands = 2 : i64, tpu.core_type = #tpu.core_type<tc>, window_params = [{transform_indices = @transform_0, window_bounds = array<i64: 8, 1024>}, {transform_indices = @transform_1, window_bounds = array<i64: 8, 1024>}, {pipeline_mode = #tpu.pipeline_mode<synchronous>, transform_indices = @transform_2, window_bounds = array<i64: 1, 1>}]} {
    %c0_i32 = arith.constant 0 : i32
    %0 = arith.cmpi eq, %arg0, %c0_i32 : i32
    %1 = arith.extui %0 : i1 to i32
    %c0_i32_0 = arith.constant 0 : i32
    %2 = arith.cmpi ne, %1, %c0_i32_0 : i32
    scf.if %2 {
      %cst_15 = arith.constant 0.000000e+00 : f32
      %16 = vector.broadcast %cst_15 : f32 to vector<8x8xf32>
      %c0_16 = arith.constant 0 : index
      %c0_17 = arith.constant 0 : index
      %17 = vector.load %arg4[%c0_16, %c0_17] : memref<8x8xf32, #tpu.memory_space<vmem>>, vector<8x8xf32>
      tpu.vector_store %arg4[%c0_16, %c0_17], %16 {strides = array<i32>} : memref<8x8xf32, #tpu.memory_space<vmem>>, vector<8x8xf32>,
      %cst_18 = arith.constant 0.000000e+00 : f32
      %18 = vector.broadcast %cst_18 : f32 to vector<8x8xf32>
      %c0_19 = arith.constant 0 : index
      %c0_20 = arith.constant 0 : index
      %19 = vector.load %arg5[%c0_19, %c0_20] : memref<8x8xf32, #tpu.memory_space<vmem>>, vector<8x8xf32>
      tpu.vector_store %arg5[%c0_19, %c0_20], %18 {strides = array<i32>} : memref<8x8xf32, #tpu.memory_space<vmem>>, vector<8x8xf32>,
    } else {
    }
    %c0 = arith.constant 0 : index
    %c0_1 = arith.constant 0 : index
    %3 = vector.load %arg1[%c0, %c0_1] : memref<8x1024xf32, #tpu.memory_space<vmem>>, vector<8x1024xf32>
    %c0_2 = arith.constant 0 : index
    %c0_3 = arith.constant 0 : index
    %4 = vector.load %arg2[%c0_2, %c0_3] : memref<8x1024xf32, #tpu.memory_space<vmem>>, vector<8x1024xf32>
    %c0_4 = arith.constant 0 : index
    %c0_5 = arith.constant 0 : index
    %5 = vector.load %arg4[%c0_4, %c0_5] : memref<8x8xf32, #tpu.memory_space<vmem>>, vector<8x8xf32>
    %cst = arith.constant dense<0.000000e+00> : vector<8x8xf32>
    %6 = tpu.matmul %3, %3, %cst {dimension_numbers = #tpu.dot_dimension_numbers<[1], [1], [0], [0], [0, 0, 1, 0], [], []>} : vector<8x1024xf32>, vector<8x1024xf32>, vector<8x8xf32> -> vector<8x8xf32>
    %7 = arith.addf %5, %6 : vector<8x8xf32>
    %c0_6 = arith.constant 0 : index
    %c0_7 = arith.constant 0 : index
    %8 = vector.load %arg4[%c0_6, %c0_7] : memref<8x8xf32, #tpu.memory_space<vmem>>, vector<8x8xf32>
    tpu.vector_store %arg4[%c0_6, %c0_7], %7 {strides = array<i32>} : memref<8x8xf32, #tpu.memory_space<vmem>>, vector<8x8xf32>,
    %c0_8 = arith.constant 0 : index
    %c0_9 = arith.constant 0 : index
    %9 = vector.load %arg5[%c0_8, %c0_9] : memref<8x8xf32, #tpu.memory_space<vmem>>, vector<8x8xf32>
    %cst_10 = arith.constant dense<0.000000e+00> : vector<8x8xf32>
    %10 = tpu.matmul %4, %4, %cst_10 {dimension_numbers = #tpu.dot_dimension_numbers<[1], [1], [0], [0], [0, 0, 1, 0], [], []>} : vector<8x1024xf32>, vector<8x1024xf32>, vector<8x8xf32> -> vector<8x8xf32>
    %11 = arith.addf %9, %10 : vector<8x8xf32>
    %c0_11 = arith.constant 0 : index
    %c0_12 = arith.constant 0 : index
    %12 = vector.load %arg5[%c0_11, %c0_12] : memref<8x8xf32, #tpu.memory_space<vmem>>, vector<8x8xf32>
    tpu.vector_store %arg5[%c0_11, %c0_12], %11 {strides = array<i32>} : memref<8x8xf32, #tpu.memory_space<vmem>>, vector<8x8xf32>,
    %c0_i32_13 = arith.constant 0 : i32
    %13 = arith.cmpi eq, %arg0, %c0_i32_13 : i32
    %14 = arith.extui %13 : i1 to i32
    %c0_i32_14 = arith.constant 0 : i32
    %15 = arith.cmpi ne, %14, %c0_i32_14 : i32
    scf.if %15 {
      %c0_15 = arith.constant 0 : index
      %c0_16 = arith.constant 0 : index
      %16 = vector.load %arg4[%c0_15, %c0_16] : memref<8x8xf32, #tpu.memory_space<vmem>>, vector<8x8xf32>
      %c0_17 = arith.constant 0 : index
      %c0_18 = arith.constant 0 : index
      %17 = vector.load %arg5[%c0_17, %c0_18] : memref<8x8xf32, #tpu.memory_space<vmem>>, vector<8x8xf32>
      %18 = tpu.iota {dimensions = array<i32: 0>} : vector<8x8xi32>
      %19 = tpu.iota {dimensions = array<i32: 1>} : vector<8x8xi32>
      %20 = arith.cmpi eq, %18, %19 : vector<8x8xi32>
      %cst_19 = arith.constant 0.000000e+00 : f32
      %21 = vector.broadcast %cst_19 : f32 to vector<8x8xf32>
      %22 = arith.select %20, %16, %21 : vector<8x8xi1>, vector<8x8xf32>
      %cst_20 = arith.constant 0.000000e+00 : f32
      %23 = vector.broadcast %cst_20 : f32 to vector<8x8xf32>
      %24 = arith.select %20, %17, %23 : vector<8x8xi1>, vector<8x8xf32>
      %cst_21 = arith.constant dense<0.000000e+00> : vector<8xf32>
      %25 = vector.multi_reduction <add>, %22, %cst_21 [1] : vector<8x8xf32> to vector<8xf32>
      %26 = vector.shape_cast %25 : vector<8xf32> to vector<8x1xf32>
      %27 = math.sqrt %26 : vector<8x1xf32>
      %cst_22 = arith.constant 9.99999997E-7 : f32
      %28 = vector.broadcast %cst_22 : f32 to vector<8x1xf32>
      %29 = arith.addf %27, %28 : vector<8x1xf32>
      %cst_23 = arith.constant 1.000000e+00 : f32
      %30 = vector.broadcast %cst_23 : f32 to vector<8x1xf32>
      %31 = arith.divf %30, %29 : vector<8x1xf32>
      %cst_24 = arith.constant dense<0.000000e+00> : vector<8xf32>
      %32 = vector.multi_reduction <add>, %22, %cst_24 [0] : vector<8x8xf32> to vector<8xf32>
      %33 = vector.shape_cast %32 : vector<8xf32> to vector<1x8xf32>
      %34 = math.sqrt %33 : vector<1x8xf32>
      %cst_25 = arith.constant 9.99999997E-7 : f32
      %35 = vector.broadcast %cst_25 : f32 to vector<1x8xf32>
      %36 = arith.addf %34, %35 : vector<1x8xf32>
      %cst_26 = arith.constant 1.000000e+00 : f32
      %37 = vector.broadcast %cst_26 : f32 to vector<1x8xf32>
      %38 = arith.divf %37, %36 : vector<1x8xf32>
      %cst_27 = arith.constant dense<0.000000e+00> : vector<8xf32>
      %39 = vector.multi_reduction <add>, %24, %cst_27 [1] : vector<8x8xf32> to vector<8xf32>
      %40 = vector.shape_cast %39 : vector<8xf32> to vector<8x1xf32>
      %41 = math.sqrt %40 : vector<8x1xf32>
      %cst_28 = arith.constant 9.99999997E-7 : f32
      %42 = vector.broadcast %cst_28 : f32 to vector<8x1xf32>
      %43 = arith.addf %41, %42 : vector<8x1xf32>
      %cst_29 = arith.constant 1.000000e+00 : f32
      %44 = vector.broadcast %cst_29 : f32 to vector<8x1xf32>
      %45 = arith.divf %44, %43 : vector<8x1xf32>
      %cst_30 = arith.constant dense<0.000000e+00> : vector<8xf32>
      %46 = vector.multi_reduction <add>, %24, %cst_30 [0] : vector<8x8xf32> to vector<8xf32>
      %47 = vector.shape_cast %46 : vector<8xf32> to vector<1x8xf32>
      %48 = math.sqrt %47 : vector<1x8xf32>
      %cst_31 = arith.constant 9.99999997E-7 : f32
      %49 = vector.broadcast %cst_31 : f32 to vector<1x8xf32>
      %50 = arith.addf %48, %49 : vector<1x8xf32>
      %cst_32 = arith.constant 1.000000e+00 : f32
      %51 = vector.broadcast %cst_32 : f32 to vector<1x8xf32>
      %52 = arith.divf %51, %50 : vector<1x8xf32>
      %53 = vector.broadcast %31 : vector<8x1xf32> to vector<8x8xf32>
      %54 = vector.broadcast %38 : vector<1x8xf32> to vector<8x8xf32>
      %55 = arith.mulf %53, %54 : vector<8x8xf32>
      %56 = arith.mulf %16, %55 : vector<8x8xf32>
      %57 = vector.broadcast %45 : vector<8x1xf32> to vector<8x8xf32>
      %58 = vector.broadcast %52 : vector<1x8xf32> to vector<8x8xf32>
      %59 = arith.mulf %57, %58 : vector<8x8xf32>
      %60 = arith.mulf %17, %59 : vector<8x8xf32>
      %61 = arith.mulf %56, %60 : vector<8x8xf32>
      %cst_33 = arith.constant dense<0.000000e+00> : vector<8xf32>
      %62 = vector.multi_reduction <add>, %61, %cst_33 [1] : vector<8x8xf32> to vector<8xf32>
      %63 = vector.shape_cast %62 : vector<8xf32> to vector<8x1xf32>
      %cst_34 = arith.constant dense<0.000000e+00> : vector<1xf32>
      %64 = vector.multi_reduction <add>, %63, %cst_34 [0] : vector<8x1xf32> to vector<1xf32>
      %65 = vector.shape_cast %64 : vector<1xf32> to vector<1x1xf32>
      %cst_35 = arith.constant 9.53674316E-7 : f32
      %66 = vector.broadcast %cst_35 : f32 to vector<1x1xf32>
      %67 = arith.mulf %65, %66 : vector<1x1xf32>
      %c0_36 = arith.constant 0 : index
      %c0_37 = arith.constant 0 : index
      %68 = vector.load %arg3[%c0_36, %c0_37] : memref<1x1xf32, #tpu.memory_space<vmem>>, vector<1x1xf32>
      tpu.vector_store %arg3[%c0_36, %c0_37], %67 {strides = array<i32>} : memref<1x1xf32, #tpu.memory_space<vmem>>, vector<1x1xf32>,
    } else {
    }
    return
  }
  func.func @transform_0(%arg0: i32) -> (i32, i32) {
    %c0_i32 = arith.constant 0 : i32
    %c0_i32_0 = arith.constant 0 : i32
    return %c0_i32, %arg0 : i32, i32
  }
  func.func @transform_1(%arg0: i32) -> (i32, i32) {
    %c0_i32 = arith.constant 0 : i32
    %c0_i32_0 = arith.constant 0 : i32
    return %c0_i32, %arg0 : i32, i32
  }
  func.func @transform_2(%arg0: i32) -> (i32, i32) {
    %c0_i32 = arith.constant 0 : i32
    %c0_i32_0 = arith.constant 0 : i32
    %c0_i32_1 = arith.constant 0 : i32
    return %c0_i32, %c0_i32_0 : i32, i32
  }
}

</mosaic_0001>

<bundles_post_ra>
// kernel: tpu_custom_call.1
= control target key start
LH: loop header
LB: loop body
LE: loop exit
PB: predicated region body
PF: predicated region fallthrough
CT: control target
= control target key end

     0   :  { %7 = vsyncpa [#allocation5], 0  ;;  %s891_s0 = inlined_call_operand.hbm [shape: f32[8,1024], index: 0, kind: input, shape index: {}]   ;;  %s892_s1 = inlined_call_operand.hbm [shape: f32[8,1024], index: 1, kind: input, shape index: {}]   ;;  %s893_s2 = inlined_call_operand.hbm [shape: f32[1,1], index: 2, kind: output, shape index: {}]  }
   0x1   :  { %8 = vsyncpa [#allocation8], 0 }
   0x2   :  { %9 = vsyncpa [#allocation6], 0  ;;  %s821_s9 = smov [#allocation4]   ;;  %s822_s11 = smov [#allocation7]  }
   0x3   :  { %s16_s10 = sshll.u32 %s821_s9, 4  ;;  %s26_s12 = sshll.u32 %s822_s11, 4  ;;  %s17_s10 = int_to_ptr.vmem [resolvable:$true] %s16_s10  ;;  %s27_s12 = int_to_ptr.vmem [resolvable:$true] %s26_s12 }
   0x4   :  { %s749_s15 = scalar_lea.hbm %s891_s0, 1024 }
   0x5   :  { %p750_p0 = scmp.ne.s32.totalorder %s891_s0, %s749_s15  ;;  %p753_p1 = scmp.lt.u32.totalorder %s749_s15, %s891_s0 }
   0x7   :  { %p755_p2 = pnand %p753_p1, %p750_p0 }
   0x9   :  { %758 = shalt.err (!%p755_p2)
}
   0xa   :  { %s759_s20 = scalar_lea.vmem %s17_s10, 1024  ;;  %p764_p4 = scmp.lt.s32.totalorder %s17_s10, %s17_s10 }
   0xb   :  { %p760_p3 = scmp.ne.s32.totalorder %s17_s10, %s759_s20  ;;  %p765_p5 = scmp.lt.s32.totalorder %s759_s20, %s759_s20 }
   0xd   :  { %p766_p6 = por %p765_p5, %p764_p4 }
   0xf   :  { %p767_p7 = pnand %p766_p6, %p760_p3 }
  0x11   :  { %770 = shalt.err (!%p767_p7)
}
  0x12   :  { %19 = dma.hbm_to_vmem [thread:$0]  %s891_s0, 1024, %s17_s10, [#allocation5]  }
  0x13   :  { %s771_s25 = scalar_lea.hbm %s892_s1, 1024 }
  0x14   :  { %p772_p8 = scmp.ne.s32.totalorder %s892_s1, %s771_s25  ;;  %p775_p9 = scmp.lt.u32.totalorder %s771_s25, %s892_s1 }
  0x16   :  { %p777_p10 = pnand %p775_p9, %p772_p8 }
  0x18   :  { %780 = shalt.err (!%p777_p10)
}
  0x19   :  { %s781_s30 = scalar_lea.vmem %s27_s12, 1024  ;;  %p786_p12 = scmp.lt.s32.totalorder %s27_s12, %s27_s12 }
  0x1a   :  { %p782_p11 = scmp.ne.s32.totalorder %s27_s12, %s781_s30  ;;  %p787_p13 = scmp.lt.s32.totalorder %s781_s30, %s781_s30 }
  0x1c   :  { %p788_p0 = por %p787_p13, %p786_p12 }
  0x1e   :  { %p789_p1 = pnand %p788_p0, %p782_p11 }
  0x20   :  { %792 = shalt.err (!%p789_p1)
}
  0x21   :  { %29 = dma.hbm_to_vmem [thread:$0]  %s892_s1, 1024, %s27_s12, [#allocation8]  }
  0x22   :  { %815 = dma.done.wait [#allocation5], 1024  }
  0x23   :  { %816 = vsyncadd [#allocation5], 4294966272 }
  0x24   :  { %817 = dma.done.wait [#allocation8], 1024  }
  0x25   :  { %818 = vsyncadd [#allocation8], 4294966272  ;;  %v44_v0 = vld [vmem:[#allocation4 + $0x8] sm:$0xff]  ;;  %v43_v1 = vld [vmem:[#allocation4] sm:$0xff]  ;;  %vm40_vm0 = vcmask 64512   ;;  %v823_v16 = vmov 0.0   ;;  %v631_v31 = vlaneseq }
  0x26   :  { %v46_v2 = vld [vmem:[#allocation4 + $0x18] sm:$0xff]  ;;  %60 = vmatprep.subr.mxu0 %v44_v0  ;;  %v45_v3 = vld [vmem:[#allocation4 + $0x10] sm:$0xff]  ;;  %v48_v4 = vld [vmem:[#allocation4 + $0x28] sm:$0xff]  ;;  %124 = vmatprep.mubr.f32.mxu0 %v44_v0  ;;  %41 = vst.msk [vmem:[#allocation2] sm:$0xff] %vm40_vm0, %v823_v16  ;;  %s824_s1 = smov [#allocation9]   ;;  %vm711_vm10 = vcmask 0  }
  0x27   :  { %130 = vmatprep.subr.mxu1 %v46_v2  ;;  %61 = vmatpush1.xpose.msra.mxu0 %v43_v1  ;;  %v50_v5 = vld [vmem:[#allocation4 + $0x38] sm:$0xff]  ;;  %v47_v6 = vld [vmem:[#allocation4 + $0x20] sm:$0xff]  ;;  %v49_v7 = vld [vmem:[#allocation4 + $0x30] sm:$0xff]  ;;  %42 = vst.msk [vmem:[#allocation3] sm:$0xff] %vm40_vm0, %v823_v16  ;;  %v632_v37 = vshrl.u32 %v631_v31, 7  ;;  %v634_v38 = vand.u32 127, %v631_v31 }
  0x28   :  { %131 = vmatpush1.xpose.msra.mxu1 %v45_v3  ;;  %194 = vmatprep.mubr.f32.mxu1 %v46_v2  ;;  %v52_v8 = vld [vmem:[#allocation7 + $0x8] sm:$0xff]  ;;  %v54_v9 = vld [vmem:[#allocation7 + $0x18] sm:$0xff]  ;;  %v51_v10 = vld [vmem:[#allocation7] sm:$0xff]  ;;  %s719_s4 = sshll.u32 %s824_s1, 4  ;;  %s720_s4 = int_to_ptr.vmem [resolvable:$true] %s719_s4 }
  0x29   :  { %200 = vmatprep.subr.mxu0 %v48_v4  ;;  %270 = vmatprep.subr.mxu1 %v50_v5  ;;  %v53_v11 = vld [vmem:[#allocation7 + $0x10] sm:$0xff]  ;;  %v56_v12 = vld [vmem:[#allocation7 + $0x28] sm:$0xff]  ;;  %v58_v13 = vld [vmem:[#allocation7 + $0x38] sm:$0xff]  ;;  %vm635_vm1 = vcmp.eq.s32.totalorder %v632_v37, %v634_v38  ;;  %s793_s5 = scalar_lea.vmem %s720_s4, 16  ;;  %s797_s6 = scalar_lea.vmem %s720_s4, 32 }
  0x2a   :  { %125 = vmatmul.mubr.f32.vlgmr.msra.gmra.mrb[0].mxu0 %v43_v1  ;;  %v55_v14 = vld [vmem:[#allocation7 + $0x20] sm:$0xff]  ;;  %v57_v15 = vld [vmem:[#allocation7 + $0x30] sm:$0xff]  ;;  %p794_p2 = scmp.ne.s32.totalorder %s720_s4, %s793_s5  ;;  %p798_p3 = scmp.lt.s32.totalorder %s720_s4, %s720_s4 }
  0x2b   :  { %195 = vmatmul.mubr.f32.vlgmr.msra.gmra.mrb[0].mxu1 %v45_v3  ;;  %201 = vmatpush1.xpose.msra.mxu0 %v47_v6  ;;  %p799_p4 = scmp.lt.s32.totalorder %s797_s6, %s793_s5 }
  0x2c   :  { %271 = vmatpush1.xpose.msra.mxu1 %v49_v7  ;;  %264 = vmatprep.mubr.f32.mxu0 %v48_v4 }
  0x2d   :  { %334 = vmatprep.mubr.f32.mxu1 %v50_v5  ;;  %344 = vmatprep.subr.mxu0 %v52_v8  ;;  %v59_v27 = vld [vmem:[#allocation2] sm:$0xff]  ;;  %p800_p5 = por %p799_p4, %p798_p3 }
  0x2e   :  { %414 = vmatprep.subr.mxu1 %v54_v9  ;;  %265 = vmatmul.mubr.f32.vlgmr.msra.gmra.mrb[2].mxu0 %v47_v6  ;;  %v343_v42 = vld [vmem:[#allocation3] sm:$0xff] }
  0x2f   :  { %335 = vmatmul.mubr.f32.vlgmr.msra.gmra.mrb[2].mxu1 %v49_v7  ;;  %345 = vmatpush1.xpose.msra.mxu0 %v51_v10  ;;  %p801_p6 = pnand %p800_p5, %p794_p2 }
  0x30   :  { %415 = vmatpush1.xpose.msra.mxu1 %v53_v11  ;;  %408 = vmatprep.mubr.f32.mxu0 %v52_v8 }
  0x31   :  { %478 = vmatprep.mubr.f32.mxu1 %v54_v9  ;;  %484 = vmatprep.subr.mxu0 %v56_v12 }
  0x32   :  { %554 = vmatprep.subr.mxu1 %v58_v13  ;;  %409 = vmatmul.mubr.f32.vlgmr.msra.gmra.mrb[4].mxu0 %v51_v10 }
  0x33   :  { %479 = vmatmul.mubr.f32.vlgmr.msra.gmra.mrb[4].mxu1 %v53_v11  ;;  %485 = vmatpush1.xpose.msra.mxu0 %v55_v14 }
  0x34   :  { %548 = vmatprep.mubr.f32.mxu0 %v56_v12  ;;  %555 = vmatpush1.xpose.msra.mxu1 %v57_v15 }
  0x35   :  { %618 = vmatprep.mubr.f32.mxu1 %v58_v13 }
  0x36   :  { %549 = vmatmul.mubr.f32.vlgmr.msra.gmra.mrb[6].mxu0 %v55_v14 }
  0x37   :  { %619 = vmatmul.mubr.f32.vlgmr.msra.gmra.mrb[6].mxu1 %v57_v15 }
  0xfd   :  { %v126_v17 = vpop.f32.mrb[0].mxu0 }
  0xfe   :  { %v196_v18 = vpop.f32.mrb[0].mxu1  ;;  %v128_v19 = vpop.f32.mrb[1].mxu0 }
  0xff   :  { %v197_v20 = vadd.f32 %v196_v18, %v126_v17  ;;  %v198_v21 = vpop.f32.mrb[1].mxu1 }
 0x101   :  { %v266_v22 = vpop.f32.mrb[2].mxu0 }
 0x102   :  { %v336_v23 = vpop.f32.mrb[2].mxu1  ;;  %v267_v24 = vadd.f32 %v266_v22, %v197_v20  ;;  %v268_v25 = vpop.f32.mrb[3].mxu0 }
 0x103   :  { %v338_v26 = vpop.f32.mrb[3].mxu1 }
 0x104   :  { %v337_v28 = vadd.f32 %v336_v23, %v267_v24 }
 0x105   :  { %v410_v29 = vpop.f32.mrb[4].mxu0 }
 0x106   :  { %v480_v30 = vpop.f32.mrb[4].mxu1  ;;  %v340_v32 = vadd.f32 %v337_v28, %v59_v27  ;;  %v412_v33 = vpop.f32.mrb[5].mxu0 }
 0x107   :  { %v481_v34 = vadd.f32 %v480_v30, %v410_v29  ;;  %v482_v35 = vpop.f32.mrb[5].mxu1 }
 0x108   :  { %342 = vst.msk [vmem:[#allocation2] sm:$0xff] %vm40_vm0, %v340_v32 }
 0x109   :  { %v550_v36 = vpop.f32.mrb[6].mxu0 }
 0x10a   :  { %v551_v39 = vadd.f32 %v550_v36, %v481_v34  ;;  %v552_v40 = vpop.f32.mrb[7].mxu0  ;;  %v620_v41 = vpop.f32.mrb[6].mxu1 }
 0x10b   :  { %v622_v43 = vpop.f32.mrb[7].mxu1 }
 0x10c   :  { %v621_v44 = vadd.f32 %v620_v41, %v551_v39 }
 0x10e   :  { %v624_v45 = vadd.f32 %v621_v44, %v343_v42 }
 0x10f   :  { %v867_v46 = vld [vmem:[#allocation2] sm:$0xff] }
 0x110   :  { %625 = vst.msk [vmem:[#allocation3] sm:$0xff] %vm40_vm0, %v624_v45  ;;  %v636_v47 = vsel %vm635_vm1, %v867_v46, 0.0 }
 0x111   :  { %v638_v48 = vsel %vm40_vm0, %v636_v47, 0.0 }
 0x112   :  { %639 = vadd.xlane.f32.xlu0 %v638_v48  ;;  %v651_v52 = vrot.slane %v638_v48, 4 }
 0x114   :  { %v652_v54 = vadd.f32 %v651_v52, %v638_v48 }
 0x116   :  { %v653_v56 = vrot.slane %v652_v54, 2 }
 0x117   :  { %v872_v49 = vld [vmem:[#allocation3] sm:$0xff] }
 0x118   :  { %v637_v50 = vsel %vm635_vm1, %v872_v49, 0.0  ;;  %v654_v58 = vadd.f32 %v653_v56, %v652_v54 }
 0x119   :  { %v667_v51 = vsel %vm40_vm0, %v637_v50, 0.0 }
 0x11a   :  { %668 = vadd.xlane.f32.xlu0 %v667_v51  ;;  %v680_v53 = vrot.slane %v667_v51, 4  ;;  %v655_v60 = vrot.slane %v654_v58, 1 }
 0x11c   :  { %v681_v55 = vadd.f32 %v680_v53, %v667_v51  ;;  %v656_v62 = vadd.f32 %v655_v60, %v654_v58 }
 0x11e   :  { %v682_v57 = vrot.slane %v681_v55, 2  ;;  %733 = vrsqrt.f32 %v656_v62  ;;  %vm659_vm3 = vcmp.eq.f32.partialorder %v656_v62, inf  ;;  %v662_v12 = vand.u32 2147483648, %v656_v62 }
 0x11f   :  { %vm661_vm6 = vcmp.eq.f32.partialorder %v656_v62, 0.0 }
 0x120   :  { %v683_v59 = vadd.f32 %v682_v57, %v681_v55 }
 0x122   :  { %v684_v61 = vrot.slane %v683_v59, 1 }
 0x124   :  { %v685_v63 = vadd.f32 %v684_v61, %v683_v59 }
 0x126   :  { %735 = vrsqrt.f32 %v685_v63  ;;  %vm688_vm5 = vcmp.eq.f32.partialorder %v685_v63, inf  ;;  %v691_v14 = vand.u32 2147483648, %v685_v63  ;;  %vm690_vm7 = vcmp.eq.f32.partialorder %v685_v63, 0.0 }
 0x128   :  { %v734_v1 = vpop.eup %733 }
 0x129   :  { %v658_v4 = vmul.f32 %v734_v1, %v656_v62 }
 0x12b   :  { %v660_v10 = vsel %vm659_vm3, %v656_v62, %v658_v4 }
 0x12c   :  { %v663_v15 = vsel %vm661_vm6, %v662_v12, %v660_v10 }
 0x12d   :  { %v664_v20 = vadd.f32 1e-06, %v663_v15 }
 0x130   :  { %v736_v2 = vpop.eup %735 }
 0x131   :  { %v687_v6 = vmul.f32 %v736_v2, %v685_v63 }
 0x133   :  { %v689_v13 = vsel %vm688_vm5, %v685_v63, %v687_v6 }
 0x134   :  { %v692_v17 = vsel %vm690_vm7, %v691_v14, %v689_v13 }
 0x135   :  { %v693_v22 = vadd.f32 1e-06, %v692_v17 }
 0x19f   :  { %v640_v0 = vpop.xlane.xlu0 %639 }
 0x1a0   :  { %737 = vrsqrt.f32 %v640_v0  ;;  %vm643_vm2 = vcmp.eq.f32.partialorder %v640_v0, inf  ;;  %v646_v8 = vand.u32 2147483648, %v640_v0  ;;  %vm645_vm4 = vcmp.eq.f32.partialorder %v640_v0, 0.0 }
 0x1a7   :  { %v669_v3 = vpop.xlane.xlu0 %668 }
 0x1a8   :  { %739 = vrsqrt.f32 %v669_v3  ;;  %vm672_vm8 = vcmp.eq.f32.partialorder %v669_v3, inf  ;;  %v675_v21 = vand.u32 2147483648, %v669_v3  ;;  %vm674_vm9 = vcmp.eq.f32.partialorder %v669_v3, 0.0 }
 0x1aa   :  { %v738_v5 = vpop.eup %737 }
 0x1ab   :  { %v642_v7 = vmul.f32 %v738_v5, %v640_v0 }
 0x1ad   :  { %v644_v9 = vsel %vm643_vm2, %v640_v0, %v642_v7 }
 0x1ae   :  { %v647_v11 = vsel %vm645_vm4, %v646_v8, %v644_v9 }
 0x1af   :  { %v648_v16 = vadd.f32 1e-06, %v647_v11 }
 0x1b1   :  { %741 = vrcp.f32 %v648_v16 }
 0x1b2   :  { %v740_v18 = vpop.eup %739  ;;  %743 = vrcp.f32 %v664_v20 }
 0x1b3   :  { %v671_v19 = vmul.f32 %v740_v18, %v669_v3  ;;  %745 = vrcp.f32 %v693_v22 }
 0x1b5   :  { %v673_v23 = vsel %vm672_vm8, %v669_v3, %v671_v19 }
 0x1b6   :  { %v676_v24 = vsel %vm674_vm9, %v675_v21, %v673_v23 }
 0x1b7   :  { %v677_v25 = vadd.f32 1e-06, %v676_v24 }
 0x1b9   :  { %747 = vrcp.f32 %v677_v25 }
 0x1bb   :  { %v742_v26 = vpop.eup %741 }
 0x1bc   :  { %v744_v27 = vpop.eup %743 }
 0x1bd   :  { %v746_v28 = vpop.eup %745  ;;  %v696_v29 = vmul.f32 %v744_v27, %v742_v26 }
 0x1bf   :  { %v697_v32 = vmul.f32 %v696_v29, %v867_v46 }
 0x1c3   :  { %v748_v30 = vpop.eup %747 }
 0x1c4   :  { %v698_v31 = vmul.f32 %v748_v30, %v746_v28 }
 0x1c6   :  { %v699_v33 = vmul.f32 %v698_v31, %v872_v49 }
 0x1c8   :  { %v700_v34 = vmul.f32 %v699_v33, %v697_v32 }
 0x1ca   :  { %v701_v35 = vsel %vm40_vm0, %v700_v34, 0.0 }
 0x1cb   :  { %702 = vadd.xlane.f32.xlu1 %v701_v35 }
 0x258   :  { %v703_v36 = vpop.xlane.xlu1 %702 }
 0x259   :  { %v704_v37 = vrot.slane %v703_v36, 4 }
 0x25b   :  { %v705_v38 = vadd.f32 %v704_v37, %v703_v36 }
 0x25d   :  { %v706_v39 = vrot.slane %v705_v38, 2 }
 0x25f   :  { %v707_v40 = vadd.f32 %v706_v39, %v705_v38 }
 0x261   :  { %v708_v41 = vrot.slane %v707_v40, 1 }
 0x263   :  { %v709_v42 = vadd.f32 %v708_v41, %v707_v40 }
 0x265   :  { %v710_v43 = vmul.f32 9.536743e-07, %v709_v42 }
 0x267   :  { %712 = vst.msk [vmem:[#allocation9] sm:$0x1] %vm711_vm10, %v710_v43 }
 0x268   :  { %804 = shalt.err (!%p801_p6)
}
 0x269   :  { %s805_s9 = scalar_lea.hbm %s893_s2, 16 }
 0x26a   :  { %p806_p7 = scmp.ne.s32.totalorder %s893_s2, %s805_s9  ;;  %p809_p8 = scmp.lt.u32.totalorder %s805_s9, %s893_s2 }
 0x26c   :  { %p811_p9 = pnand %p809_p8, %p806_p7 }
 0x26e   :  { %814 = shalt.err (!%p811_p9)
}
 0x26f   :  { %722 = dma.vmem_to_hbm [thread:$0]  %s720_s4, 16, %s893_s2, [#allocation6]  }
 0x270   :  { %819 = dma.done.wait [#allocation6], 16  }
 0x271   :  { %820 = vsyncadd [#allocation6], 4294967280 }
 0x272   :  { %726 = vsyncpa [#allocation5], 1 }
 0x273   :  { %727 = vsyncpa [#allocation8], 1 }
 0x274   :  { %728 = vsyncpa [#allocation6], 1 }

</bundles_post_ra>
